<compile_context>
chip_gen: v7x
topology: tpu7x:2x2x1
jax: 0.10.0
libtpu: 0.0.40
codegen_flags: <defaults>
</compile_context>

<pallas_src>
import functools

import jax
import jax.numpy as jnp
from jax.experimental import pallas as pl
from jax.experimental.pallas import tpu as pltpu

MARGIN = 0.4
EPS = 1e-8
_LANES = 128
_SUBLANES = 8


def _round_up(x, m):
    return (x + m - 1) // m * m


def _contrastive_cosine_block_kernel(o1_ref, o2_ref, label_ref, out_ref, *,
                                     margin, batch_size, block_rows,
                                     needs_mask):
    i = pl.program_id(0)

    x1 = o1_ref[...].astype(jnp.float32)       # (TB, D)
    x2 = o2_ref[...].astype(jnp.float32)       # (TB, D)
    lab = label_ref[...].astype(jnp.float32)   # (TB, 1)  (label.squeeze(1) semantics)

    # Row-wise cosine similarity (F.cosine_similarity, dim=1, eps=1e-8).
    dot = jnp.sum(x1 * x2, axis=1, keepdims=True)             # (TB, 1)
    n1sq = jnp.sum(x1 * x1, axis=1, keepdims=True)            # (TB, 1)
    n2sq = jnp.sum(x2 * x2, axis=1, keepdims=True)            # (TB, 1)
    # Keep the eps clamp on the norm product for parity with the PyTorch op.
    n12 = jnp.maximum(jnp.sqrt(n1sq) * jnp.sqrt(n2sq), EPS)   # (TB, 1)
    cos = dot * pl.reciprocal(n12, approx=False)              # EUP reciprocal

    # Match term: label * (1 - cos)^2 / 4
    match_term = lab * jnp.square(1.0 - cos) * 0.25
    # Non-match term: (1 - label) * (cos * (cos < margin))^2
    gated = jnp.where(cos < margin, cos, 0.0)
    nonmatch_term = (1.0 - lab) * jnp.square(gated)
    contrib = match_term + nonmatch_term                      # (TB, 1)

    if needs_mask:
        # Mask rows past the true batch size (ragged last tile): OOB block
        # rows are not guaranteed zero, so they must not contribute.
        row = jax.lax.broadcasted_iota(jnp.int32, contrib.shape, 0) + i * block_rows
        contrib = jnp.where(row < batch_size, contrib, 0.0)

    # Per-block partial sum, written as a lane-dense (1, 128) row: partial in
    # lane 0, zeros elsewhere.  Wrapper sums all partials and divides by B.
    partial = jnp.sum(contrib)
    lane = jax.lax.broadcasted_iota(jnp.int32, (1, _LANES), 1)
    out_ref[...] = jnp.where(lane == 0, partial, 0.0)


def contrastive_loss_cosine(output1, output2, label, margin=MARGIN,
                            block_rows=1024):
    """output1, output2: (B, D) f32/bf16; label: (B, 1). Returns scalar f32 loss."""
    B, D = output1.shape
    assert output2.shape == (B, D)
    assert label.shape == (B, 1)

    itemsize = jnp.dtype(output1.dtype).itemsize
    d_pad = _round_up(D, _LANES)

    # Row tile: large for HBM-roofline pipelining, but capped so the
    # double-buffered working set (2 inputs x 2 bufs + lane-padded label x 2)
    # stays within ~24 MiB even for wide D, and capped at the sublane-padded
    # batch so tiny batches stay a single block.
    bytes_per_row = 2 * 2 * d_pad * itemsize + 2 * _LANES * 4
    tb_budget = max((24 << 20) // bytes_per_row, _SUBLANES)
    tb = min(block_rows, tb_budget, _round_up(B, _SUBLANES))
    tb = max(_round_up(tb, _SUBLANES) if tb % _SUBLANES else tb, _SUBLANES)
    tb = _round_up(tb, _SUBLANES)
    num_blocks = pl.cdiv(B, tb)

    # VMEM budgeting with lane padding: a (TB, D) block physically occupies
    # TB x roundup(D,128) x itemsize per buffer; the (TB, 1) label pads to
    # TB x 128 x 4.  Two inputs x 2 buffers + label x 2 buffers + tiny output.
    in_buf_bytes = tb * d_pad * itemsize
    lab_buf_bytes = tb * _LANES * 4
    out_bytes = num_blocks * _LANES * 4
    vmem_needed = 2 * 2 * in_buf_bytes + 2 * lab_buf_bytes + out_bytes
    # Generous headroom, floored at 16 MiB (v5e scoped default) and capped at
    # 32 MiB so it also fits v7x's smaller 64 MiB physical VMEM.
    vmem_limit = int(min(max(4 * vmem_needed, 16 << 20), 32 << 20))

    kernel = functools.partial(
        _contrastive_cosine_block_kernel,
        margin=margin, batch_size=B, block_rows=tb,
        needs_mask=(B % tb != 0))

    partials = pl.pallas_call(
        kernel,
        out_shape=jax.ShapeDtypeStruct((num_blocks, _LANES), jnp.float32),
        grid=(num_blocks,),
        in_specs=[
            pl.BlockSpec((tb, D), lambda i: (i, 0)),
            pl.BlockSpec((tb, D), lambda i: (i, 0)),
            pl.BlockSpec((tb, 1), lambda i: (i, 0)),
        ],
        out_specs=pl.BlockSpec((1, _LANES), lambda i: (i, 0)),
        compiler_params=pltpu.CompilerParams(
            dimension_semantics=("parallel",),   # no cross-block carry
            vmem_limit_bytes=vmem_limit,
        ),
    )(output1, output2, label)

    # Final reduction: sum of per-block partials divided by the true B.
    return jnp.sum(partials) / jnp.float32(B)


def contrastive_loss_cosine_ref(output1, output2, label, margin=MARGIN):
    """Pure-JAX reference mirroring the PyTorch forward."""
    lab = jnp.squeeze(label, axis=1).astype(jnp.float32)
    x1 = output1.astype(jnp.float32)
    x2 = output2.astype(jnp.float32)
    dot = jnp.sum(x1 * x2, axis=1)
    n1 = jnp.linalg.norm(x1, axis=1)
    n2 = jnp.linalg.norm(x2, axis=1)
    cos = dot / jnp.maximum(n1 * n2, EPS)
    match_term = lab * jnp.square(1.0 - cos) / 4.0
    nonmatch_term = (1.0 - lab) * jnp.square(cos * (cos < margin).astype(jnp.float32))
    return jnp.mean(match_term + nonmatch_term)


if __name__ == "__main__":
    key = jax.random.PRNGKey(0)
    k1, k2, k3, k4, k5, k6 = jax.random.split(key, 6)

    # Primary small-shape check (matches the module's (B, D) embeddings + (B,1) label).
    B, D = 8, 32
    output1 = jax.random.normal(k1, (B, D), dtype=jnp.float32)
    output2 = jax.random.normal(k2, (B, D), dtype=jnp.float32)
    label = jax.random.bernoulli(k3, 0.5, (B, 1)).astype(jnp.float32)

    loss = contrastive_loss_cosine(output1, output2, label)
    jax.block_until_ready(loss)
    ref = contrastive_loss_cosine_ref(output1, output2, label)
    assert jnp.allclose(loss, ref, atol=1e-5, rtol=1e-5), (loss, ref)

    # Extra check exercising the tiled path: multiple blocks + ragged last tile.
    B2, D2 = 200, 32
    o1b = jax.random.normal(k4, (B2, D2), dtype=jnp.float32)
    o2b = jax.random.normal(k5, (B2, D2), dtype=jnp.float32)
    labb = jax.random.bernoulli(k6, 0.5, (B2, 1)).astype(jnp.float32)
    loss2 = contrastive_loss_cosine(o1b, o2b, labb, block_rows=64)
    jax.block_until_ready(loss2)
    ref2 = contrastive_loss_cosine_ref(o1b, o2b, labb)
    assert jnp.allclose(loss2, ref2, atol=1e-5, rtol=1e-5), (loss2, ref2)

    # bf16 path (halves HBM traffic; accumulation stays f32 in-kernel).
    loss3 = contrastive_loss_cosine(o1b.astype(jnp.bfloat16),
                                    o2b.astype(jnp.bfloat16), labb,
                                    block_rows=64)
    jax.block_until_ready(loss3)
    assert jnp.allclose(loss3, ref2, atol=5e-3, rtol=5e-3), (loss3, ref2)

    print("KERNEL_OK")
</pallas_src>

<mosaic_0001>
module attributes {stable_mosaic.version = 11 : i64} {
  func.func @_contrastive_cosine_block_kernel(%arg0: i32, %arg1: memref<8x32xf32, #tpu.memory_space<vmem>>, %arg2: memref<8x32xf32, #tpu.memory_space<vmem>>, %arg3: memref<8x1xf32, #tpu.memory_space<vmem>>, %arg4: memref<1x128xf32, #tpu.memory_space<vmem>>) attributes {dimension_semantics = [#tpu.dimension_semantics<parallel>], iteration_bounds = array<i64: 1>, scalar_prefetch = 0 : i64, scratch_operands = 0 : i64, tpu.core_type = #tpu.core_type<tc>, window_params = [{transform_indices = @transform_0, window_bounds = array<i64: 8, 32>}, {transform_indices = @transform_1, window_bounds = array<i64: 8, 32>}, {transform_indices = @transform_2, window_bounds = array<i64: 8, 1>}, {transform_indices = @transform_3, window_bounds = array<i64: 1, 128>}]} {
    %c0 = arith.constant 0 : index
    %c0_0 = arith.constant 0 : index
    %0 = vector.load %arg1[%c0, %c0_0] : memref<8x32xf32, #tpu.memory_space<vmem>>, vector<8x32xf32>
    %c0_1 = arith.constant 0 : index
    %c0_2 = arith.constant 0 : index
    %1 = vector.load %arg2[%c0_1, %c0_2] : memref<8x32xf32, #tpu.memory_space<vmem>>, vector<8x32xf32>
    %c0_3 = arith.constant 0 : index
    %c0_4 = arith.constant 0 : index
    %2 = vector.load %arg3[%c0_3, %c0_4] : memref<8x1xf32, #tpu.memory_space<vmem>>, vector<8x1xf32>
    %3 = arith.mulf %0, %1 : vector<8x32xf32>
    %cst = arith.constant dense<0.000000e+00> : vector<8xf32>
    %4 = vector.multi_reduction <add>, %3, %cst [1] : vector<8x32xf32> to vector<8xf32>
    %5 = vector.shape_cast %4 : vector<8xf32> to vector<8x1xf32>
    %6 = arith.mulf %0, %0 : vector<8x32xf32>
    %cst_5 = arith.constant dense<0.000000e+00> : vector<8xf32>
    %7 = vector.multi_reduction <add>, %6, %cst_5 [1] : vector<8x32xf32> to vector<8xf32>
    %8 = vector.shape_cast %7 : vector<8xf32> to vector<8x1xf32>
    %9 = arith.mulf %1, %1 : vector<8x32xf32>
    %cst_6 = arith.constant dense<0.000000e+00> : vector<8xf32>
    %10 = vector.multi_reduction <add>, %9, %cst_6 [1] : vector<8x32xf32> to vector<8xf32>
    %11 = vector.shape_cast %10 : vector<8xf32> to vector<8x1xf32>
    %12 = math.sqrt %8 : vector<8x1xf32>
    %13 = math.sqrt %11 : vector<8x1xf32>
    %14 = arith.mulf %12, %13 : vector<8x1xf32>
    %cst_7 = arith.constant 9.99999993E-9 : f32
    %15 = vector.broadcast %cst_7 : f32 to vector<8x1xf32>
    %16 = arith.maximumf %14, %15 : vector<8x1xf32>
    %17 = tpu.reciprocal %16 : vector<8x1xf32> -> vector<8x1xf32>
    %18 = arith.mulf %5, %17 : vector<8x1xf32>
    %cst_8 = arith.constant 1.000000e+00 : f32
    %19 = vector.broadcast %cst_8 : f32 to vector<8x1xf32>
    %20 = arith.subf %19, %18 : vector<8x1xf32>
    %21 = arith.mulf %20, %20 : vector<8x1xf32>
    %22 = arith.mulf %2, %21 : vector<8x1xf32>
    %cst_9 = arith.constant 2.500000e-01 : f32
    %23 = vector.broadcast %cst_9 : f32 to vector<8x1xf32>
    %24 = arith.mulf %22, %23 : vector<8x1xf32>
    %cst_10 = arith.constant 4.000000e-01 : f32
    %25 = vector.broadcast %cst_10 : f32 to vector<8x1xf32>
    %26 = arith.cmpf olt, %18, %25 : vector<8x1xf32>
    %cst_11 = arith.constant 0.000000e+00 : f32
    %27 = vector.broadcast %cst_11 : f32 to vector<8x1xf32>
    %28 = arith.select %26, %18, %27 : vector<8x1xi1>, vector<8x1xf32>
    %cst_12 = arith.constant 1.000000e+00 : f32
    %29 = vector.broadcast %cst_12 : f32 to vector<8x1xf32>
    %30 = arith.subf %29, %2 : vector<8x1xf32>
    %31 = arith.mulf %28, %28 : vector<8x1xf32>
    %32 = arith.mulf %30, %31 : vector<8x1xf32>
    %33 = arith.addf %24, %32 : vector<8x1xf32>
    %34 = vector.shape_cast %33 : vector<8x1xf32> to vector<1x8x1xf32>
    %cst_13 = arith.constant dense<0.000000e+00> : vector<1xf32>
    %35 = vector.multi_reduction <add>, %34, %cst_13 [1, 2] : vector<1x8x1xf32> to vector<1xf32>
    %36 = vector.shape_cast %35 : vector<1xf32> to vector<1x1x1xf32>
    %37 = vector.extract %36[0, 0, 0] : f32 from vector<1x1x1xf32>
    %38 = tpu.iota {dimensions = array<i32: 1>} : vector<1x128xi32>
    %c0_i32 = arith.constant 0 : i32
    %39 = vector.broadcast %c0_i32 : i32 to vector<1x128xi32>
    %40 = arith.cmpi eq, %38, %39 : vector<1x128xi32>
    %cst_14 = arith.constant 0.000000e+00 : f32
    %41 = vector.broadcast %37 : f32 to vector<1x128xf32>
    %42 = vector.broadcast %cst_14 : f32 to vector<1x128xf32>
    %43 = arith.select %40, %41, %42 : vector<1x128xi1>, vector<1x128xf32>
    %c0_15 = arith.constant 0 : index
    %c0_16 = arith.constant 0 : index
    %44 = vector.load %arg4[%c0_15, %c0_16] : memref<1x128xf32, #tpu.memory_space<vmem>>, vector<1x128xf32>
    tpu.vector_store %arg4[%c0_15, %c0_16], %43 {strides = array<i32>} : memref<1x128xf32, #tpu.memory_space<vmem>>, vector<1x128xf32>,
    return
  }
  func.func @transform_0(%arg0: i32) -> (i32, i32) {
    %c0_i32 = arith.constant 0 : i32
    %c0_i32_0 = arith.constant 0 : i32
    return %arg0, %c0_i32 : i32, i32
  }
  func.func @transform_1(%arg0: i32) -> (i32, i32) {
    %c0_i32 = arith.constant 0 : i32
    %c0_i32_0 = arith.constant 0 : i32
    return %arg0, %c0_i32 : i32, i32
  }
  func.func @transform_2(%arg0: i32) -> (i32, i32) {
    %c0_i32 = arith.constant 0 : i32
    %c0_i32_0 = arith.constant 0 : i32
    return %arg0, %c0_i32 : i32, i32
  }
  func.func @transform_3(%arg0: i32) -> (i32, i32) {
    %c0_i32 = arith.constant 0 : i32
    %c0_i32_0 = arith.constant 0 : i32
    return %arg0, %c0_i32 : i32, i32
  }
}

</mosaic_0001>

<bundles_post_ra>
// kernel: tpu_custom_call.1
= control target key start
LH: loop header
LB: loop body
LE: loop exit
PB: predicated region body
PF: predicated region fallthrough
CT: control target
= control target key end

     0   :  { %8 = vsyncpa [#allocation3], 0  ;;  %s213_s0 = inlined_call_operand.vmem [shape: f32[8,32], index: 0, kind: input, shape index: {}]   ;;  %s214_s1 = inlined_call_operand.hbm [shape: f32[8,32], index: 1, kind: input, shape index: {}]   ;;  %s215_s2 = inlined_call_operand.vmem [shape: f32[8,1], index: 2, kind: input, shape index: {}]   ;;  %s216_s3 = inlined_call_operand.hbm [shape: f32[1,128], index: 3, kind: output, shape index: {}]  }
   0x1   :  { %9 = vsyncpa [#allocation4], 0  ;;  %s161_s12 = smov [#allocation2]   ;;  %s113_s16 = scalar_lea.hbm %s214_s1, 128 }
   0x2   :  { %s18_s13 = sshll.u32 %s161_s12, 4  ;;  %p114_p0 = scmp.ne.s32.totalorder %s214_s1, %s113_s16  ;;  %s19_s13 = int_to_ptr.vmem [resolvable:$true] %s18_s13 }
   0x3   :  { %p117_p1 = scmp.lt.u32.totalorder %s113_s16, %s214_s1 }
   0x5   :  { %p119_p2 = pnand %p117_p1, %p114_p0 }
   0x7   :  { %122 = shalt.err (!%p119_p2)
}
   0x8   :  { %s123_s21 = scalar_lea.vmem %s19_s13, 128  ;;  %p128_p4 = scmp.lt.s32.totalorder %s19_s13, %s19_s13 }
   0x9   :  { %p124_p3 = scmp.ne.s32.totalorder %s19_s13, %s123_s21  ;;  %p129_p5 = scmp.lt.s32.totalorder %s123_s21, %s123_s21 }
   0xb   :  { %p130_p6 = por %p129_p5, %p128_p4 }
   0xd   :  { %p131_p7 = pnand %p130_p6, %p124_p3 }
   0xf   :  { %134 = shalt.err (!%p131_p7)
}
  0x10   :  { %21 = dma.hbm_to_vmem [thread:$0]  %s214_s1, 128, %s19_s13, [#allocation3]  }
  0x11   :  { %157 = dma.done.wait [#allocation3], 128  }
  0x12   :  { %158 = vsyncadd [#allocation3], 4294967168  ;;  %v27_v0 = vld [vmem:[%s213_s0] sm:$0xff]  ;;  %vm31_vm0 = vcmask 261120   ;;  %vm71_vm6 = vcmask 7168   ;;  %v82_v43 = vlaneseq }
  0x13   :  { %v28_v1 = vld [vmem:[#allocation2] sm:$0xff]  ;;  %v35_v2 = vmul.f32 %v27_v0, %v27_v0 }
  0x14   :  { %v39_v3 = vmul.f32 %v28_v1, %v28_v1  ;;  %v30_v4 = vmul.f32 %v28_v1, %v27_v0  ;;  %v29_v25 = vld [vmem:[%s215_s2] sm:$0xff]  ;;  %v83_v44 = vand.u32 127, %v82_v43  ;;  %s162_s2 = smov [#allocation5]  }
  0x15   :  { %v36_v5 = vsel %vm31_vm0, %v35_v2, 0.0  ;;  %v67_v30 = vsub.f32 1.0, %v29_v25  ;;  %s94_s26 = sshll.u32 %s162_s2, 4  ;;  %s95_s26 = int_to_ptr.vmem [resolvable:$true] %s94_s26 }
  0x16   :  { %v32_v6 = vsel %vm31_vm0, %v30_v4, 0.0  ;;  %37 = vadd.xlane.f32.xlu0 %v36_v5  ;;  %v40_v7 = vsel %vm31_vm0, %v39_v3, 0.0  ;;  %vm84_vm7 = vcmp.eq.s32.totalorder %v83_v44, 0  ;;  %s135_s28 = scalar_lea.vmem %s95_s26, 16  ;;  %s139_s29 = scalar_lea.vmem %s95_s26, 32 }
  0x17   :  { %33 = vadd.xlane.f32.xlu1 %v32_v6  ;;  %p136_p8 = scmp.ne.s32.totalorder %s95_s26, %s135_s28  ;;  %p140_p9 = scmp.lt.s32.totalorder %s95_s26, %s95_s26 }
  0x18   :  { %p141_p10 = scmp.lt.s32.totalorder %s139_s29, %s135_s28 }
  0x1a   :  { %41 = vadd.xlane.f32.xlu0 %v40_v7  ;;  %p142_p11 = por %p141_p10, %p140_p9 }
  0x1c   :  { %p143_p12 = pnand %p142_p11, %p136_p8 }
  0xa3   :  { %v38_v8 = vpop.xlane.xlu0 %37 }
  0xa4   :  { %107 = vrsqrt.f32 %v38_v8  ;;  %vm45_vm1 = vcmp.eq.f32.partialorder %v38_v8, inf  ;;  %v48_v15 = vand.u32 2147483648, %v38_v8  ;;  %vm47_vm3 = vcmp.eq.f32.partialorder %v38_v8, 0.0  ;;  %v34_v22 = vpop.xlane.xlu1 %33 }
  0xa7   :  { %v42_v9 = vpop.xlane.xlu0 %41 }
  0xa8   :  { %109 = vrsqrt.f32 %v42_v9  ;;  %vm52_vm2 = vcmp.eq.f32.partialorder %v42_v9, inf  ;;  %v55_v16 = vand.u32 2147483648, %v42_v9  ;;  %vm54_vm4 = vcmp.eq.f32.partialorder %v42_v9, 0.0 }
  0xae   :  { %v108_v10 = vpop.eup %107 }
  0xaf   :  { %v44_v11 = vmul.f32 %v108_v10, %v38_v8 }
  0xb1   :  { %v46_v13 = vsel %vm45_vm1, %v38_v8, %v44_v11 }
  0xb2   :  { %v110_v12 = vpop.eup %109  ;;  %v49_v18 = vsel %vm47_vm3, %v48_v15, %v46_v13 }
  0xb3   :  { %v51_v14 = vmul.f32 %v110_v12, %v42_v9 }
  0xb5   :  { %v53_v17 = vsel %vm52_vm2, %v42_v9, %v51_v14 }
  0xb6   :  { %v56_v19 = vsel %vm54_vm4, %v55_v16, %v53_v17 }
  0xb7   :  { %v57_v20 = vmul.f32 %v56_v19, %v49_v18 }
  0xb9   :  { %v58_v21 = vmax.f32 %v57_v20, 1e-08 }
  0xbb   :  { %111 = vrcp.f32 %v58_v21 }
  0xc5   :  { %v112_v23 = vpop.eup %111 }
  0xc6   :  { %v60_v24 = vmul.f32 %v112_v23, %v34_v22 }
  0xc8   :  { %v61_v26 = vsub.f32 1.0, %v60_v24  ;;  %vm65_vm5 = vcmp.lt.f32.partialorder %v60_v24, 0.4 }
  0xc9   :  { %v66_v27 = vsel %vm65_vm5, %v60_v24, 0.0 }
  0xca   :  { %v62_v28 = vmul.f32 %v61_v26, %v61_v26  ;;  %v68_v29 = vmul.f32 %v66_v27, %v66_v27 }
  0xcc   :  { %v63_v31 = vmul.f32 %v62_v28, %v29_v25  ;;  %v69_v33 = vmul.f32 %v68_v29, %v67_v30 }
  0xce   :  { %v64_v32 = vmul.f32 0.25, %v63_v31 }
  0xd0   :  { %v70_v34 = vadd.f32 %v69_v33, %v64_v32 }
  0xd2   :  { %v72_v35 = vsel %vm71_vm6, %v70_v34, 0.0 }
  0xd3   :  { %73 = vadd.xlane.f32.xlu1 %v72_v35 }
 0x160   :  { %v74_v36 = vpop.xlane.xlu1 %73 }
 0x161   :  { %v75_v37 = vrot.slane %v74_v36, 4 }
 0x163   :  { %v76_v38 = vadd.f32 %v75_v37, %v74_v36 }
 0x165   :  { %v77_v39 = vrot.slane %v76_v38, 2 }
 0x167   :  { %v78_v40 = vadd.f32 %v77_v39, %v76_v38 }
 0x169   :  { %v79_v41 = vrot.slane %v78_v40, 1 }
 0x16b   :  { %v80_v42 = vadd.f32 %v79_v41, %v78_v40 }
 0x16d   :  { %103 = vpush %v80_v42 }
 0x19e   :  { %s104_s27 = spop %103 }
 0x19f   :  { %v85_v45 = vstv %s104_s27 }
 0x1a0   :  { %v86_v46 = vsel %vm84_vm7, %v85_v45, 0.0 }
 0x1a1   :  { %87 = vst [vmem:[#allocation5] sm:$0x1] %v86_v46 }
 0x1a2   :  { %146 = shalt.err (!%p143_p12)
}
 0x1a3   :  { %s147_s5 = scalar_lea.hbm %s216_s3, 16 }
 0x1a4   :  { %p148_p13 = scmp.ne.s32.totalorder %s216_s3, %s147_s5  ;;  %p151_p0 = scmp.lt.u32.totalorder %s147_s5, %s216_s3 }
 0x1a6   :  { %p153_p1 = pnand %p151_p0, %p148_p13 }
 0x1a8   :  { %156 = shalt.err (!%p153_p1)
}
 0x1a9   :  { %97 = dma.vmem_to_hbm [thread:$0]  %s95_s26, 16, %s216_s3, [#allocation4]  }
 0x1aa   :  { %159 = dma.done.wait [#allocation4], 16  }
 0x1ab   :  { %160 = vsyncadd [#allocation4], 4294967280 }
 0x1ac   :  { %101 = vsyncpa [#allocation3], 1 }
 0x1ad   :  { %102 = vsyncpa [#allocation4], 1 }

</bundles_post_ra>
